<compile_context>
chip_gen: v6e
topology: v6e:2x2x1
jax: 0.10.0
libtpu: 0.0.40
codegen_flags: <defaults>
</compile_context>

<pallas_src>
import math

import jax
import jax.numpy as jnp
from jax.experimental import pallas as pl
from jax.experimental.pallas import tpu as pltpu


# --------------------------------------------------------------------------- #
# Kernels
# --------------------------------------------------------------------------- #
def _epilogue(proj, w_ref, b_scalar, o_ref):
    """sqrt / log / row-mean / Linear / LeakyReLU tail shared by both variants.

    proj: (R, 2*Fp) f32 -- [cos-projection | sin-projection] of the input rows.
    """
    Fp = w_ref.shape[1]
    re = proj[:, :Fp]                       # lane-aligned split (Fp % 128 == 0)
    im = proj[:, Fp:]                       # sign irrelevant, only squared
    amp = jnp.sqrt(re * re + im * im)       # |rfft|
    log_amp = jnp.log(amp + 1e-8)           # matches the PyTorch module exactly
    row_sum = jnp.sum(log_amp, axis=0, keepdims=True)          # (1, Fp)
    # 1/R (the row mean) is folded into w by the wrapper; padded frequency
    # lanes contribute exactly 0 because w == 0 there.
    y = jnp.sum(row_sum * w_ref[...], axis=1, keepdims=True) + b_scalar
    o_ref[...] = jnp.where(y > 0.0, y, 0.2 * y)                 # LeakyReLU(0.2)


def _spectral_critic_kernel(x_ref, dft_ref, w_ref, b_ref, o_ref):
    # Grid-less variant: whole operands resident in VMEM, bias in SMEM.
    proj = jnp.dot(x_ref[...], dft_ref[...], preferred_element_type=jnp.float32)
    _epilogue(proj, w_ref, b_ref[0, 0], o_ref)


def _spectral_critic_kernel_ktiled(x_ref, dft_ref, w_ref, b_ref, o_ref, acc_ref):
    # K-tiled variant: the contraction (time) axis streams through the pipeline.
    k = pl.program_id(0)

    @pl.when(k == 0)
    def _():
        acc_ref[...] = jnp.zeros_like(acc_ref)

    acc_ref[...] += jnp.dot(x_ref[...], dft_ref[...],
                            preferred_element_type=jnp.float32)

    @pl.when(k == pl.num_programs(0) - 1)
    def _():
        _epilogue(acc_ref[...], w_ref, b_ref[0, 0], o_ref)


# --------------------------------------------------------------------------- #
# Factory
# --------------------------------------------------------------------------- #
def _dft_matrix(T, F, Fp, dtype):
    """Fused [cos | sin] real-DFT matrix, each half zero-padded to Fp lanes."""
    if T & (T - 1) == 0:
        # Power-of-two T: uint32 wrap-around is mod 2^32 and T | 2^32, so the
        # masked product is exact even when t*k exceeds the int32 range.
        t = jnp.arange(T, dtype=jnp.uint32)[:, None]
        k = jnp.arange(F, dtype=jnp.uint32)[None, :]
        tk = (t * k) & jnp.uint32(T - 1)
    else:
        assert T <= 46340, "t*k would overflow int32; widen the intermediate"
        t = jnp.arange(T, dtype=jnp.int32)[:, None]
        k = jnp.arange(F, dtype=jnp.int32)[None, :]
        tk = (t * k) % T
    ang = (2.0 * math.pi / T) * tk.astype(jnp.float32)
    pad = ((0, 0), (0, Fp - F))
    return jnp.concatenate([jnp.pad(jnp.cos(ang), pad),
                            jnp.pad(jnp.sin(ang), pad)], axis=1).astype(dtype)


def _choose_tk(T, Fp, tk, elem_bytes):
    """Return the contraction tile (multiple of 128) or None for grid-less."""
    if tk is not None:
        assert tk % 128 == 0 and T % tk == 0 and tk < T, "invalid forced tk"
        return tk
    dft_bytes = T * 2 * Fp * elem_bytes
    if dft_bytes <= (4 << 20) or T % 256 != 0:
        return None                     # small stage: whole dft stays in VMEM
    # Largest power-of-two-scaled tile that divides T and keeps one dft tile
    # under ~2 MiB (x2 buffers -> fits v5e's 16 MiB default scoped VMEM).
    best, cand = None, 256
    while cand < T and T % cand == 0:
        if cand * 2 * Fp * elem_bytes <= (2 << 20):
            best = cand
        cand *= 2
    return best


def make_spectral_critic_forward(B, C, T, *, tk=None, dft_dtype=jnp.float32):
    """Build a jitted forward(x, y, w, b) for fixed (B, C, T).

    The DFT matrix is computed once here (hoisted out of the per-step path).
    Set dft_dtype=jnp.bfloat16 on v6e/v7x to halve HBM/VMEM traffic of the
    constant matrix (re-validate the parity tolerance if you do)."""
    R = B * C
    F = T // 2 + 1
    Fp = 128 * pl.cdiv(F, 128)          # pad frequency axis to a lane multiple

    dft = _dft_matrix(T, F, Fp, dft_dtype)
    tk_sel = _choose_tk(T, Fp, tk, jnp.dtype(dft_dtype).itemsize)

    if tk_sel is None:
        # Single-step path: no grid -> no double-buffering, no pipeline DMAs.
        kernel_call = pl.pallas_call(
            _spectral_critic_kernel,
            out_shape=jax.ShapeDtypeStruct((1, 1), jnp.float32),
            in_specs=[
                pl.BlockSpec(memory_space=pltpu.MemorySpace.VMEM),   # x (R, T)
                pl.BlockSpec(memory_space=pltpu.MemorySpace.VMEM),   # dft
                pl.BlockSpec(memory_space=pltpu.MemorySpace.VMEM),   # w (1, Fp)
                pl.BlockSpec(memory_space=pltpu.MemorySpace.SMEM),   # b (1, 1)
            ],
            out_specs=pl.BlockSpec(memory_space=pltpu.MemorySpace.VMEM),
        )
    else:
        # K-tiled path: stream (tk, 2*Fp) dft blocks, accumulate in VMEM scratch.
        kernel_call = pl.pallas_call(
            _spectral_critic_kernel_ktiled,
            out_shape=jax.ShapeDtypeStruct((1, 1), jnp.float32),
            grid_spec=pltpu.PrefetchScalarGridSpec(
                num_scalar_prefetch=0,
                grid=(T // tk_sel,),
                in_specs=[
                    pl.BlockSpec((R, tk_sel), lambda k: (0, k)),
                    pl.BlockSpec((tk_sel, 2 * Fp), lambda k: (k, 0)),
                    pl.BlockSpec((1, Fp), lambda k: (0, 0)),
                    pl.BlockSpec((1, 1), lambda k: (0, 0),
                                 memory_space=pltpu.MemorySpace.SMEM),
                ],
                out_specs=pl.BlockSpec((1, 1), lambda k: (0, 0)),
                scratch_shapes=[pltpu.VMEM((R, 2 * Fp), jnp.float32)],
            ),
            compiler_params=pltpu.CompilerParams(
                dimension_semantics=("arbitrary",)),
        )

    @jax.jit
    def forward(x, y, w, b):
        del y  # unused, matches the PyTorch forward signature
        x2d = x.reshape(R, T).astype(jnp.float32)
        # Fold the 1/R row-mean into the Linear weight; zero-pad to Fp lanes.
        w_scaled = jnp.pad(w.reshape(1, F).astype(jnp.float32) * (1.0 / R),
                           ((0, 0), (0, Fp - F)))
        b2d = b.reshape(1, 1).astype(jnp.float32)
        out = kernel_call(x2d, dft, w_scaled, b2d)
        # PyTorch: Linear(F, 1) applied to a 1-D vector -> shape (1,)
        return out.reshape(1)

    return forward


# --------------------------------------------------------------------------- #
# Pure-JAX reference (mirrors the PyTorch module)
# --------------------------------------------------------------------------- #
def _reference(x, w, b):
    fft = jnp.fft.rfft(x)
    fft_abs = jnp.abs(fft) + 1e-8
    fft_log = jnp.log(fft_abs)
    fft_mean = jnp.mean(fft_log, axis=(0, 1))
    z = fft_mean @ w.reshape(-1) + b.reshape(())
    return jnp.where(z > 0, z, 0.2 * z).reshape(1)


if __name__ == "__main__":
    key = jax.random.PRNGKey(0)
    kx, ky, kw, kb, kx2, kw2, kb2 = jax.random.split(key, 7)

    # ---- Test 1: the module's configuration (grid-less path) --------------
    # SpectralCritic(n_samples=64, n_stages=3, current_stage=1)
    #   _stage = n_stages - current_stage = 2
    #   selected block in_size = 64 / 2**2 / 2 + 1 = 9 -> stage input length T = 16
    n_samples, n_stages, current_stage = 64, 3, 1
    _stage = n_stages - current_stage
    T = n_samples // (2 ** _stage)
    F = T // 2 + 1
    B, C = 2, 4

    x = jax.random.normal(kx, (B, C, T), dtype=jnp.float32)
    y_unused = jax.random.normal(ky, (B, C, T), dtype=jnp.float32)  # ignored

    bound = 1.0 / math.sqrt(F)
    w = jax.random.uniform(kw, (1, F), minval=-bound, maxval=bound,
                           dtype=jnp.float32)
    b = jax.random.uniform(kb, (1,), minval=-bound, maxval=bound,
                           dtype=jnp.float32)

    forward = make_spectral_critic_forward(B, C, T)
    out = forward(x, y_unused, w, b)
    jax.block_until_ready(out)
    ref = _reference(x, w, b)
    assert out.shape == (1,)
    assert jnp.allclose(out, ref, atol=1e-4, rtol=1e-4), (out, ref)

    # ---- Test 2: exercise the K-tiled path (larger stage) ------------------
    T2 = 1024
    F2 = T2 // 2 + 1
    x2 = jax.random.normal(kx2, (B, C, T2), dtype=jnp.float32)
    bound2 = 1.0 / math.sqrt(F2)
    w2 = jax.random.uniform(kw2, (1, F2), minval=-bound2, maxval=bound2,
                            dtype=jnp.float32)
    b2 = jax.random.uniform(kb2, (1,), minval=-bound2, maxval=bound2,
                            dtype=jnp.float32)

    forward_tiled = make_spectral_critic_forward(B, C, T2, tk=256)
    out2 = forward_tiled(x2, x2, w2, b2)
    jax.block_until_ready(out2)
    ref2 = _reference(x2, w2, b2)
    assert out2.shape == (1,)
    assert jnp.allclose(out2, ref2, atol=5e-4, rtol=5e-4), (out2, ref2)

    print("KERNEL_OK")
</pallas_src>

<mosaic_0001>
module attributes {stable_mosaic.version = 11 : i64} {
  func.func @_spectral_critic_kernel(%arg0: memref<8x16xf32, #tpu.memory_space<vmem>>, %arg1: memref<16x256xf32, #tpu.memory_space<vmem>>, %arg2: memref<1x128xf32, #tpu.memory_space<vmem>>, %arg3: memref<1x1xf32, #tpu.memory_space<smem>>, %arg4: memref<1x1xf32, #tpu.memory_space<vmem>>) attributes {dimension_semantics = [], scalar_prefetch = 0 : i64, scratch_operands = 0 : i64, tpu.core_type = #tpu.core_type<tc>} {
    %c0 = arith.constant 0 : index
    %c0_0 = arith.constant 0 : index
    %0 = vector.load %arg0[%c0, %c0_0] : memref<8x16xf32, #tpu.memory_space<vmem>>, vector<8x16xf32>
    %c0_1 = arith.constant 0 : index
    %c0_2 = arith.constant 0 : index
    %1 = vector.load %arg1[%c0_1, %c0_2] : memref<16x256xf32, #tpu.memory_space<vmem>>, vector<16x256xf32>
    %cst = arith.constant dense<0.000000e+00> : vector<8x256xf32>
    %2 = tpu.matmul %0, %1, %cst {dimension_numbers = #tpu.dot_dimension_numbers<[1], [0], [0], [1], [0, 0, 1, 1], [], []>} : vector<8x16xf32>, vector<16x256xf32>, vector<8x256xf32> -> vector<8x256xf32>
    %c0_3 = arith.constant 0 : index
    %c0_4 = arith.constant 0 : index
    %3 = memref.load %arg3[%c0_3, %c0_4] : memref<1x1xf32, #tpu.memory_space<smem>>
    %4 = vector.extract_strided_slice %2 {offsets = [0, 0], sizes = [8, 128], strides = [1, 1]} : vector<8x256xf32> to vector<8x128xf32>
    %5 = vector.extract_strided_slice %2 {offsets = [0, 128], sizes = [8, 128], strides = [1, 1]} : vector<8x256xf32> to vector<8x128xf32>
    %6 = arith.mulf %4, %4 : vector<8x128xf32>
    %7 = arith.mulf %5, %5 : vector<8x128xf32>
    %8 = arith.addf %6, %7 : vector<8x128xf32>
    %9 = math.sqrt %8 : vector<8x128xf32>
    %cst_5 = arith.constant 9.99999993E-9 : f32
    %10 = vector.broadcast %cst_5 : f32 to vector<8x128xf32>
    %11 = arith.addf %9, %10 : vector<8x128xf32>
    %12 = math.log %11 : vector<8x128xf32>
    %cst_6 = arith.constant dense<0.000000e+00> : vector<128xf32>
    %13 = vector.multi_reduction <add>, %12, %cst_6 [0] : vector<8x128xf32> to vector<128xf32>
    %14 = vector.shape_cast %13 : vector<128xf32> to vector<1x128xf32>
    %c0_7 = arith.constant 0 : index
    %c0_8 = arith.constant 0 : index
    %15 = vector.load %arg2[%c0_7, %c0_8] : memref<1x128xf32, #tpu.memory_space<vmem>>, vector<1x128xf32>
    %16 = arith.mulf %14, %15 : vector<1x128xf32>
    %cst_9 = arith.constant dense<0.000000e+00> : vector<1xf32>
    %17 = vector.multi_reduction <add>, %16, %cst_9 [1] : vector<1x128xf32> to vector<1xf32>
    %18 = vector.shape_cast %17 : vector<1xf32> to vector<1x1xf32>
    %19 = vector.broadcast %3 : f32 to vector<1x1xf32>
    %20 = arith.addf %18, %19 : vector<1x1xf32>
    %cst_10 = arith.constant 0.000000e+00 : f32
    %21 = vector.broadcast %cst_10 : f32 to vector<1x1xf32>
    %22 = arith.cmpf ogt, %20, %21 : vector<1x1xf32>
    %cst_11 = arith.constant 2.000000e-01 : f32
    %23 = vector.broadcast %cst_11 : f32 to vector<1x1xf32>
    %24 = arith.mulf %23, %20 : vector<1x1xf32>
    %25 = arith.select %22, %20, %24 : vector<1x1xi1>, vector<1x1xf32>
    %c0_12 = arith.constant 0 : index
    %c0_13 = arith.constant 0 : index
    %26 = vector.load %arg4[%c0_12, %c0_13] : memref<1x1xf32, #tpu.memory_space<vmem>>, vector<1x1xf32>
    tpu.vector_store %arg4[%c0_12, %c0_13], %25 {strides = array<i32>} : memref<1x1xf32, #tpu.memory_space<vmem>>, vector<1x1xf32>,
    return
  }
}

</mosaic_0001>

<bundles_post_ra>
// kernel: forward.1
= control target key start
LH: loop header
LB: loop body
LE: loop exit
PB: predicated region body
PF: predicated region fallthrough
CT: control target
= control target key end

     0   :  { %10 = vsyncpa [#allocation4], 0  ;;  %s260_s0 = inlined_call_operand.vmem [shape: f32[8,16], index: 0, kind: input, shape index: {}]   ;;  %s261_s1 = inlined_call_operand.hbm [shape: f32[16,256], index: 1, kind: input, shape index: {}]   ;;  %s262_s2 = inlined_call_operand.vmem [shape: f32[1,128], index: 2, kind: input, shape index: {}]   ;;  %s263_s3 = inlined_call_operand.<no memory space> [shape: f32[1,1], index: 3, kind: input, shape index: {}]   ;;  %s264_s4 = inlined_call_operand.hbm [shape: f32[1,1], index: 4, kind: output, shape index: {}]  }
   0x1   :  { %11 = vsyncpa [#allocation5], 0  ;;  %s215_s15 = smov [#allocation3]  }
   0x2   :  { %s19_s16 = sshll.u32 %s215_s15, 4  ;;  %s20_s16 = int_to_ptr.vmem [resolvable:$true] %s19_s16 }
   0x3   :  { %s179_s17 = scalar_lea.vmem %s20_s16, 512  ;;  %p184_p1 = scmp.lt.s32.totalorder %s20_s16, %s20_s16 }
   0x4   :  { %p180_p0 = scmp.ne.s32.totalorder %s20_s16, %s179_s17  ;;  %p185_p2 = scmp.lt.s32.totalorder %s179_s17, %s179_s17 }
   0x6   :  { %p186_p3 = por %p185_p2, %p184_p1 }
   0x8   :  { %p187_p4 = pnand %p186_p3, %p180_p0 }
   0xa   :  { %190 = shalt.err (!%p187_p4)
}
   0xb   :  { %s216_s18 = smov 256   ;;  %s217_s19 = smov 16  }
   0xc   :  { %25 = dma.hbm_to_vmem [thread:$0]  %s261_s1, 512, %s20_s16, [#allocation4], %s216_s18, %s216_s18, %s217_s19  }
   0xd   :  { %211 = dma.done.wait [#allocation4], 512  }
   0xe   :  { %212 = vsyncadd [#allocation4], 4294966784  ;;  %v218_v0 = vmov 0.0   ;;  %v37_v1 = vld [vmem:[#allocation3 + $0x18] sm:$0xff]  ;;  %v36_v2 = vld [vmem:[#allocation3 + $0x10] sm:$0xff]  ;;  %vm38_vm0 = vcmask 130048   ;;  %v139_v28 = vstv %s263_s3 }
   0xf   :  { %106 = vmatprep.mubr.f32.mxu0 %v218_v0  ;;  %v35_v3 = vld [vmem:[#allocation3 + $0x8] sm:$0xff]  ;;  %70 = vmatprep.subr.mxu0 %v37_v1  ;;  %v34_v4 = vld [vmem:[#allocation3] sm:$0xff]  ;;  %vm135_vm3 = vcmask 1040384   ;;  %s219_s26 = smov [#allocation6]   ;;  %vm144_vm5 = vcmask 0  }
  0x10   :  { %71 = vmatpush1.msra.mxu0 %v36_v2  ;;  %v33_v5 = vld [vmem:[%s260_s0] sm:$0xff]  ;;  %s152_s27 = sshll.u32 %s219_s26, 4  ;;  %s153_s27 = int_to_ptr.vmem [resolvable:$true] %s152_s27 }
  0x11   :  { %72 = vmatprep.subr.mxu0 %v35_v3  ;;  %v133_v24 = vld [vmem:[%s262_s2] sm:$0x1]  ;;  %s191_s2 = scalar_lea.vmem %s153_s27, 16  ;;  %s195_s28 = scalar_lea.vmem %s153_s27, 32 }
  0x12   :  { %73 = vmatpush1.msra.mxu0 %v34_v4  ;;  %p192_p5 = scmp.ne.s32.totalorder %s153_s27, %s191_s2  ;;  %p196_p6 = scmp.lt.s32.totalorder %s153_s27, %s153_s27 }
  0x13   :  { %161 = vmatmul.mubr.msk.f32.vlgmr.msra.gmra.mxu0 %vm38_vm0, %v33_v5  ;;  %p197_p7 = scmp.lt.s32.totalorder %s195_s28, %s191_s2 }
  0x15   :  { %p198_p8 = por %p197_p7, %p196_p6 }
  0x17   :  { %p199_p9 = pnand %p198_p8, %p192_p5 }
  0xd3   :  { %v108_v6 = vpop.f32.mrf.mxu0 }
  0xd4   :  { %v114_v8 = vmul.f32 %v108_v6, %v108_v6 }
  0xd5   :  { %v110_v7 = vpop.f32.mrf.mxu0 }
  0xd6   :  { %v115_v9 = vmul.f32 %v110_v7, %v110_v7 }
  0xd8   :  { %v116_v10 = vadd.f32 %v115_v9, %v114_v8 }
  0xda   :  { %167 = vrsqrt.f32 %v116_v10  ;;  %vm119_vm1 = vcmp.eq.f32.partialorder %v116_v10, inf  ;;  %v122_v13 = vand.u32 2147483648, %v116_v10  ;;  %vm121_vm2 = vcmp.eq.f32.partialorder %v116_v10, 0.0 }
  0xe7   :  { %v168_v11 = vpop.eup %167 }
  0xe8   :  { %v118_v12 = vmul.f32 %v168_v11, %v116_v10 }
  0xea   :  { %v120_v14 = vsel %vm119_vm1, %v116_v10, %v118_v12 }
  0xeb   :  { %v123_v15 = vsel %vm121_vm2, %v122_v13, %v120_v14 }
  0xec   :  { %v124_v16 = vadd.f32 1e-08, %v123_v15 }
  0xee   :  { %169 = vlog2.f32 %v124_v16 }
  0xfb   :  { %v170_v17 = vpop.eup %169 }
  0xfc   :  { %v126_v18 = vmul.f32 0.6931472, %v170_v17 }
  0xfe   :  { %v127_v19 = vrot.slane %v126_v18, 4 }
 0x100   :  { %v128_v20 = vadd.f32 %v127_v19, %v126_v18 }
 0x102   :  { %v129_v21 = vrot.slane %v128_v20, 2 }
 0x104   :  { %v130_v22 = vadd.f32 %v129_v21, %v128_v20 }
 0x106   :  { %v131_v23 = vrot.slane %v130_v22, 1 }
 0x108   :  { %v132_v25 = vadd.f32 %v131_v23, %v130_v22 }
 0x10a   :  { %v134_v26 = vmul.f32 %v133_v24, %v132_v25 }
 0x10c   :  { %v136_v27 = vsel %vm135_vm3, %v134_v26, 0.0 }
 0x10d   :  { %137 = vadd.xlane.f32.xlu0 %v136_v27 }
 0x196   :  { %v138_v29 = vpop.xlane.xlu0 %137 }
 0x197   :  { %v140_v30 = vadd.f32 %v139_v28, %v138_v29 }
 0x199   :  { %vm141_vm4 = vcmp.gt.f32.partialorder %v140_v30, 0.0  ;;  %v142_v31 = vmul.f32 0.2, %v140_v30 }
 0x19b   :  { %v143_v32 = vsel %vm141_vm4, %v140_v30, %v142_v31 }
 0x19c   :  { %145 = vst.msk [vmem:[#allocation6] sm:$0x1] %vm144_vm5, %v143_v32 }
 0x19d   :  { %202 = shalt.err (!%p199_p9)
}
 0x19e   :  { %155 = dma.vmem_to_hbm [thread:$0]  %s153_s27, 16, %s264_s4, [#allocation5]  }
 0x19f   :  { %213 = dma.done.wait [#allocation5], 16  }
 0x1a0   :  { %214 = vsyncadd [#allocation5], 4294967280 }
 0x1a1   :  { %159 = vsyncpa [#allocation4], 1 }
 0x1a2   :  { %160 = vsyncpa [#allocation5], 1 }

</bundles_post_ra>
